<compile_context>
chip_gen: v7x
topology: tpu7x:2x2x1
jax: 0.10.0
libtpu: 0.0.40
codegen_flags: <defaults>
</compile_context>

<pallas_src>
import jax
import jax.numpy as jnp
from jax.experimental import pallas as pl
from jax.experimental.pallas import tpu as pltpu


def _excitation_kernel(x_ref, w_ref, b_ref, inv_ref, o_ref):
    # x_ref:   (1, C, HW) activation slab for one batch element
    # w_ref:   (C, C)     PyTorch Linear weight layout (out_features, in_features)
    # b_ref:   (C, 1)     bias as a column vector
    # inv_ref: (HW, 1)    column filled with 1/HW (mean scaling folded in)
    # o_ref:   (1, C, HW)

    # --- squeeze: global average pool over H*W, done on the MXU ---
    pooled = jnp.dot(x_ref[0], inv_ref[...],
                     preferred_element_type=jnp.float32)            # (C, 1)

    # --- dense + bias:  y = W @ pooled + b  (== pooled_row @ W^T + b) ---
    y = jnp.dot(w_ref[...], pooled,
                preferred_element_type=jnp.float32) + b_ref[...]    # (C, 1)

    # --- sigmoid gate ---
    scale = jax.nn.sigmoid(y)                                       # (C, 1)

    # --- excite: re-read the ref (do not keep the (C,HW) tile live across the
    #     reduction) and broadcast-multiply over the spatial axis ---
    o_ref[0] = (x_ref[0] * scale).astype(o_ref.dtype)


def excitation(x_nchw, weight, bias, *, donate_x=False):
    """SE 'excite' block.

    x_nchw: (B, C, H, W) float32
    weight: (C, C)  torch nn.Linear weight layout (out_features, in_features)
    bias:   (C,)
    donate_x: alias x to the output (saves an HBM allocation); only set when
              the caller does not need x afterwards.
    """
    B, C, H, W = x_nchw.shape
    HW = H * W
    dt = x_nchw.dtype
    itemsize = jnp.dtype(dt).itemsize

    x = x_nchw.reshape(B, C, HW)
    w = weight.astype(jnp.float32)
    b_col = bias.reshape(C, 1).astype(jnp.float32)
    inv_col = jnp.full((HW, 1), 1.0 / HW, dtype=jnp.float32)

    # ---------------- VMEM budgeting ----------------
    try:
        vmem_cap = int(pltpu.get_tpu_info().vmem_capacity_bytes)
    except Exception:
        vmem_cap = 64 * 1024 * 1024          # conservative (v7x per-TC VMEM)
    vmem_cap = max(32 << 20, min(vmem_cap, 128 << 20))
    budget = int(vmem_cap * 0.9)

    slab = C * HW * itemsize                                  # one (1,C,HW) tile
    params = 2 * (C * C * 4 + C * 4 + HW * 4)                 # W/bias/1-HW cols
    margin = 2 << 20                                          # pipeline overhead

    def need(in_bufs, out_bufs):
        return (in_bufs + out_bufs) * slab + params + margin

    # Prefer full double buffering; degrade buffering when the slab is too big
    # (e.g. very large C*HW on v7x's halved VMEM) but keep the fused pass.
    if need(2, 2) <= budget:
        in_bufs, out_bufs = 2, 2
    elif need(2, 1) <= budget:
        in_bufs, out_bufs = 2, 1
    else:
        # TODO(synk): for slabs that do not fit even single-buffered, fall back
        # to a two-pass layout (scale=(B,C) reduction pass + HW-tiled multiply).
        in_bufs, out_bufs = 1, 1

    vmem_limit = int(min(budget, max(32 << 20, int(need(in_bufs, out_bufs) * 1.25))))

    def x_spec(bufs):
        kwargs = {} if bufs == 2 else dict(pipeline_mode=pl.Buffered(bufs))
        return pl.BlockSpec((1, C, HW), lambda b: (b, 0, 0), **kwargs)

    call_kwargs = {}
    if donate_x:
        call_kwargs["input_output_aliases"] = {0: 0}

    out = pl.pallas_call(
        _excitation_kernel,
        out_shape=jax.ShapeDtypeStruct((B, C, HW), dt),
        grid_spec=pltpu.PrefetchScalarGridSpec(
            num_scalar_prefetch=0,
            grid=(B,),
            in_specs=[
                x_spec(in_bufs),                                  # x
                pl.BlockSpec((C, C), lambda b: (0, 0)),           # weight
                pl.BlockSpec((C, 1), lambda b: (0, 0)),           # bias
                pl.BlockSpec((HW, 1), lambda b: (0, 0)),          # 1/HW column
            ],
            out_specs=x_spec(out_bufs),
        ),
        compiler_params=pltpu.CompilerParams(
            dimension_semantics=("parallel",),   # batch shards across TCs (v7x)
            vmem_limit_bytes=vmem_limit,
        ),
        **call_kwargs,
    )(x, w, b_col, inv_col)

    return out.reshape(B, C, H, W)


if __name__ == "__main__":
    B, C, H, W = 2, 4, 16, 16

    key = jax.random.PRNGKey(0)
    kx, kw, kb = jax.random.split(key, 3)

    x = jax.random.normal(kx, (B, C, H, W), dtype=jnp.float32)
    # Deterministic params mimicking nn.Linear(C, C) init: U(-1/sqrt(C), 1/sqrt(C))
    bound = 1.0 / jnp.sqrt(jnp.float32(C))
    weight = jax.random.uniform(kw, (C, C), jnp.float32, -bound, bound)
    bias = jax.random.uniform(kb, (C,), jnp.float32, -bound, bound)

    out = excitation(x, weight, bias)
    out = jax.block_until_ready(out)

    # Pure-JAX reference for verification
    pooled = jnp.mean(x, axis=(2, 3))                       # (B, C)
    e = jax.nn.sigmoid(pooled @ weight.T + bias)            # (B, C)
    ref = x * e[:, :, None, None]                           # (B, C, H, W)

    assert out.shape == (B, C, H, W)
    # Tolerance leaves headroom for MXU f32 pass decomposition / accumulation
    # order in the pooling matvec; genuine bugs (wrong gate, bias, broadcast)
    # produce errors orders of magnitude larger.
    assert jnp.allclose(out, ref, atol=1e-3, rtol=1e-3), "mismatch vs reference"
    print("KERNEL_OK")
</pallas_src>

<mosaic_0001>
module attributes {stable_mosaic.version = 11 : i64} {
  func.func @_excitation_kernel(%arg0: i32, %arg1: memref<1x4x256xf32, #tpu.memory_space<vmem>>, %arg2: memref<4x4xf32, #tpu.memory_space<vmem>>, %arg3: memref<4x1xf32, #tpu.memory_space<vmem>>, %arg4: memref<256x1xf32, #tpu.memory_space<vmem>>, %arg5: memref<1x4x256xf32, #tpu.memory_space<vmem>>) attributes {dimension_semantics = [#tpu.dimension_semantics<parallel>], iteration_bounds = array<i64: 2>, scalar_prefetch = 0 : i64, scratch_operands = 0 : i64, tpu.core_type = #tpu.core_type<tc>, window_params = [{transform_indices = @transform_0, window_bounds = array<i64: 1, 4, 256>}, {pipeline_mode = #tpu.pipeline_mode<synchronous>, transform_indices = @transform_1, window_bounds = array<i64: 4, 4>}, {pipeline_mode = #tpu.pipeline_mode<synchronous>, transform_indices = @transform_2, window_bounds = array<i64: 4, 1>}, {pipeline_mode = #tpu.pipeline_mode<synchronous>, transform_indices = @transform_3, window_bounds = array<i64: 256, 1>}, {transform_indices = @transform_4, window_bounds = array<i64: 1, 4, 256>}]} {
    %c0 = arith.constant 0 : index
    %c0_0 = arith.constant 0 : index
    %c0_1 = arith.constant 0 : index
    %0 = vector.load %arg1[%c0, %c0_0, %c0_1] : memref<1x4x256xf32, #tpu.memory_space<vmem>>, vector<1x4x256xf32>
    %1 = vector.shape_cast %0 : vector<1x4x256xf32> to vector<4x256xf32>
    %c0_2 = arith.constant 0 : index
    %c0_3 = arith.constant 0 : index
    %2 = vector.load %arg4[%c0_2, %c0_3] : memref<256x1xf32, #tpu.memory_space<vmem>>, vector<256x1xf32>
    %cst = arith.constant dense<0.000000e+00> : vector<4x1xf32>
    %3 = tpu.matmul %1, %2, %cst {dimension_numbers = #tpu.dot_dimension_numbers<[1], [0], [0], [1], [0, 0, 1, 1], [], []>} : vector<4x256xf32>, vector<256x1xf32>, vector<4x1xf32> -> vector<4x1xf32>
    %c0_4 = arith.constant 0 : index
    %c0_5 = arith.constant 0 : index
    %4 = vector.load %arg2[%c0_4, %c0_5] : memref<4x4xf32, #tpu.memory_space<vmem>>, vector<4x4xf32>
    %cst_6 = arith.constant dense<0.000000e+00> : vector<4x1xf32>
    %5 = tpu.matmul %4, %3, %cst_6 {dimension_numbers = #tpu.dot_dimension_numbers<[1], [0], [0], [1], [0, 0, 1, 1], [], []>} : vector<4x4xf32>, vector<4x1xf32>, vector<4x1xf32> -> vector<4x1xf32>
    %c0_7 = arith.constant 0 : index
    %c0_8 = arith.constant 0 : index
    %6 = vector.load %arg3[%c0_7, %c0_8] : memref<4x1xf32, #tpu.memory_space<vmem>>, vector<4x1xf32>
    %7 = arith.addf %5, %6 : vector<4x1xf32>
    %8 = arith.negf %7 : vector<4x1xf32>
    %9 = math.exp %8 : vector<4x1xf32>
    %cst_9 = arith.constant 1.000000e+00 : f32
    %10 = vector.broadcast %cst_9 : f32 to vector<4x1xf32>
    %11 = arith.addf %10, %9 : vector<4x1xf32>
    %12 = arith.divf %10, %11 : vector<4x1xf32>
    %c0_10 = arith.constant 0 : index
    %c0_11 = arith.constant 0 : index
    %c0_12 = arith.constant 0 : index
    %13 = vector.load %arg1[%c0_10, %c0_11, %c0_12] : memref<1x4x256xf32, #tpu.memory_space<vmem>>, vector<1x4x256xf32>
    %14 = vector.shape_cast %13 : vector<1x4x256xf32> to vector<4x256xf32>
    %15 = vector.broadcast %12 : vector<4x1xf32> to vector<4x256xf32>
    %16 = arith.mulf %14, %15 : vector<4x256xf32>
    %c0_13 = arith.constant 0 : index
    %c0_14 = arith.constant 0 : index
    %c0_15 = arith.constant 0 : index
    %17 = vector.load %arg5[%c0_13, %c0_14, %c0_15] : memref<1x4x256xf32, #tpu.memory_space<vmem>>, vector<1x4x256xf32>
    %18 = vector.shape_cast %17 : vector<1x4x256xf32> to vector<4x256xf32>
    %19 = vector.shape_cast %16 : vector<4x256xf32> to vector<1x4x256xf32>
    tpu.vector_store %arg5[%c0_13, %c0_14, %c0_15], %19 {strides = array<i32>} : memref<1x4x256xf32, #tpu.memory_space<vmem>>, vector<1x4x256xf32>,
    return
  }
  func.func @transform_0(%arg0: i32) -> (i32, i32, i32) {
    %c0_i32 = arith.constant 0 : i32
    %c0_i32_0 = arith.constant 0 : i32
    %c0_i32_1 = arith.constant 0 : i32
    return %arg0, %c0_i32, %c0_i32_0 : i32, i32, i32
  }
  func.func @transform_1(%arg0: i32) -> (i32, i32) {
    %c0_i32 = arith.constant 0 : i32
    %c0_i32_0 = arith.constant 0 : i32
    %c0_i32_1 = arith.constant 0 : i32
    return %c0_i32, %c0_i32_0 : i32, i32
  }
  func.func @transform_2(%arg0: i32) -> (i32, i32) {
    %c0_i32 = arith.constant 0 : i32
    %c0_i32_0 = arith.constant 0 : i32
    %c0_i32_1 = arith.constant 0 : i32
    return %c0_i32, %c0_i32_0 : i32, i32
  }
  func.func @transform_3(%arg0: i32) -> (i32, i32) {
    %c0_i32 = arith.constant 0 : i32
    %c0_i32_0 = arith.constant 0 : i32
    %c0_i32_1 = arith.constant 0 : i32
    return %c0_i32, %c0_i32_0 : i32, i32
  }
  func.func @transform_4(%arg0: i32) -> (i32, i32, i32) {
    %c0_i32 = arith.constant 0 : i32
    %c0_i32_0 = arith.constant 0 : i32
    %c0_i32_1 = arith.constant 0 : i32
    return %arg0, %c0_i32, %c0_i32_0 : i32, i32, i32
  }
}

</mosaic_0001>

<bundles_post_ra>
// kernel: tpu_custom_call.1
= control target key start
LH: loop header
LB: loop body
LE: loop exit
PB: predicated region body
PF: predicated region fallthrough
CT: control target
= control target key end

     0   :  { %9 = vsyncpa [#allocation3], 0  ;;  %s918_s0 = inlined_call_operand.vmem [shape: f32[2,4,256], index: 0, kind: input, shape index: {}]   ;;  %s919_s1 = inlined_call_operand.vmem [shape: f32[4,4], index: 1, kind: input, shape index: {}]   ;;  %s920_s2 = inlined_call_operand.vmem [shape: f32[4,1], index: 2, kind: input, shape index: {}]   ;;  %s921_s3 = inlined_call_operand.vmem [shape: f32[256,1], index: 3, kind: input, shape index: {}]   ;;  %s922_s4 = inlined_call_operand.hbm [shape: f32[2,4,256], index: 4, kind: output, shape index: {}]  }
   0x1   :  { %11 = vsyncpa [#allocation3 + $0x1], 0  ;;  %s710_s15 = smov 0   ;;  %s712_s16 = smov 0  }
   0x2   :  { %s714_s17 = smov 0   ;;  %s716_s18 = smov 0  }
   0x3 LB: > { %s731_s19 = sadd.s32 4294967295, %s678_s18   ;;  %s476_s20 = sadd.s32 4294967294, %s678_s18   ;;  %s678_s18 = sphi %s716_s18, %s928_s18   ;;  %s674_s17 = sphi %s714_s17, %s927_s17   ;;  %s670_s16 = sphi %s712_s16, %s926_s16   ;;  %s666_s15 = sphi %s710_s15, %s925_s15  }
   0x4   : > { %s735_s21 = sadd.s32 1, %s678_s18   ;;  %s113_s22 = sadd.s32 1, %s674_s17 }
   0x5   : > { %s110_s23 = ssub.s32 %s678_s18, %s735_s21  ;;  %p123_p0 = scmp.ne.s32.totalorder %s674_s17, %s670_s16 }
   0x6   : > { %p111_p1 = scmp.eq.s32.totalorder %s110_s23, 0  ;;  %p124_p2 = scmp.eq.s32.totalorder %s731_s19, 1 }
   0x7   : > { %p129_p3 = scmp.ne.s32.totalorder %s670_s16, %s666_s15  ;;  %p130_p4 = scmp.eq.s32.totalorder %s476_s20, 1 }
   0x8   : > { %s746_s24 = scalar_select %p111_p1, %s674_s17, %s113_s22  }
   0x9   : > { %p748_p5 = por %p124_p2, %p123_p0  ;;  %p752_p6 = por %p130_p4, %p129_p3 }
   0xa   : > { %p479_p7 = scmp.ge.s32.totalorder %s678_s18, 1  ;;  %p165_p8 = scmp.lt.s32.totalorder %s678_s18, 3 }
   0xc   : > { %p166_p9 = pnand %p479_p7, %p165_p8 }
   0xd   : > { %v213_v0 = vld [vmem:[%s921_s3 + $0x80] sm:$0xff] (!%p166_p9)  ;;  %v214_v1 = vld [vmem:[%s921_s3 + $0x88] sm:$0xff] (!%p166_p9)  ;;  %p191_p10 = scmp.lt.s32.totalorder (!%p166_p9), %s731_s19, 1  ;;  %v215_v5 = vld [vmem:[%s921_s3 + $0x90] sm:$0xff] (!%p166_p9)  ;;  %v680_v50 = vmov (!%p166_p9), 0.0   ;;  %vm681_vm0 = vmmov (!%p166_p9), 0  }
   0xe   : > { %169 = sbr.rel (%p166_p9) target bundleno = 650 (0x28a), region = 36  ;;  %v197_v2 = vld [vmem:[%s921_s3] sm:$0xff] (!%p166_p9)  ;;  %v535_v3 = vpack.c.bf16 (!%p166_p9), %v214_v1, %v213_v0  ;;  %v198_v4 = vld [vmem:[%s921_s3 + $0x8] sm:$0xff] (!%p166_p9)  ;;  %v216_v6 = vld [vmem:[%s921_s3 + $0x98] sm:$0xff] (!%p166_p9)  ;;  %530 = vmatprep.subr.mxu1 (!%p166_p9), %v680_v50  ;;  %532 = vmatprep.mubr.msk.f32.mxu1 (!%p166_p9), %vm681_vm0, %v680_v50  ;;  %vm308_vm1 = vcmask (!%p166_p9), 1043456   ;;  %vm304_vm2 = vcmask (!%p166_p9), 31744  }
   0xf   : > { %v537_v7 = vpack.c.bf16 (!%p166_p9), %v198_v4, %v197_v2  ;;  %v539_v8 = vpack.c.bf16 (!%p166_p9), %v216_v6, %v215_v5  ;;  %v199_v9 = vld [vmem:[%s921_s3 + $0x10] sm:$0xff] (!%p166_p9)  ;;  %v200_v10 = vld [vmem:[%s921_s3 + $0x18] sm:$0xff] (!%p166_p9)  ;;  %v217_v11 = vld [vmem:[%s921_s3 + $0xa0] sm:$0xff] (!%p166_p9)  ;;  %v682_v55 = vmov (!%p166_p9), 0   ;;  %v683_v0 = vmov (!%p166_p9), 839922192  }
  0x10   : > { %536 = vmatprep.subr.bf16.mxu0 (!%p166_p9), %v535_v3  ;;  %v218_v12 = vld [vmem:[%s921_s3 + $0xa8] sm:$0xff] (!%p166_p9)  ;;  %v541_v13 = vpack.c.bf16 (!%p166_p9), %v200_v10, %v199_v9  ;;  %v201_v15 = vld [vmem:[%s921_s3 + $0x20] sm:$0xff] (!%p166_p9)  ;;  %v219_v17 = vld [vmem:[%s921_s3 + $0xb0] sm:$0xff] (!%p166_p9)  ;;  %610 = vset.pattern.permute.xlu0 (!%p166_p9), %v682_v55  ;;  %v393_v1 = vunpack.c.l.s4 (!%p166_p9), %v683_v0  ;;  %v395_v2 = vlaneseq (!%p166_p9)  ;;  %s188_s7 = sand.u32 (!%p166_p9), 1, %s670_s16  }
  0x11   : > { %538 = vmatpush3.bf16.msra.mxu0 (!%p166_p9), %v537_v7  ;;  %v543_v14 = vpack.c.bf16 (!%p166_p9), %v218_v12, %v217_v11  ;;  %v202_v16 = vld [vmem:[%s921_s3 + $0x28] sm:$0xff] (!%p166_p9)  ;;  %v220_v18 = vld [vmem:[%s921_s3 + $0xb8] sm:$0xff] (!%p166_p9)  ;;  %v203_v21 = vld [vmem:[%s921_s3 + $0x30] sm:$0xff] (!%p166_p9)  ;;  %s480_s8 = sshll.u32 (!%p166_p9), %s188_s7, 3  ;;  %s403_s14 = scalar_lea.sflag (!%p166_p9), [#allocation3], %s188_s7 }
  0x12   : > { %540 = vmatprep.subr.bf16.mxu0 (!%p166_p9), %v539_v8  ;;  %v545_v19 = vpack.c.bf16 (!%p166_p9), %v202_v16, %v201_v15  ;;  %v547_v20 = vpack.c.bf16 (!%p166_p9), %v220_v18, %v219_v17  ;;  %v204_v22 = vld [vmem:[%s921_s3 + $0x38] sm:$0xff] (!%p166_p9)  ;;  %v221_v23 = vld [vmem:[%s921_s3 + $0xc0] sm:$0xff] (!%p166_p9)  ;;  %v222_v24 = vld [vmem:[%s921_s3 + $0xc8] sm:$0xff] (!%p166_p9)  ;;  %v394_v3 = vunpack.c.0.s8 (!%p166_p9), %v393_v1  ;;  %v396_v4 = vshrl.u32 (!%p166_p9), %v395_v2, 7  ;;  %s190_s9 = scalar_lea.vmem (!%p166_p9), [#allocation2], %s480_s8 }
  0x13   : > { %v549_v27 = vpack.c.bf16 (!%p166_p9), %v204_v22, %v203_v21  ;;  %v551_v28 = vpack.c.bf16 (!%p166_p9), %v222_v24, %v221_v23  ;;  %v205_v29 = vld [vmem:[%s921_s3 + $0x40] sm:$0xff] (!%p166_p9)  ;;  %v206_v30 = vld [vmem:[%s921_s3 + $0x48] sm:$0xff] (!%p166_p9)  ;;  %v223_v31 = vld [vmem:[%s921_s3 + $0xd0] sm:$0xff] (!%p166_p9)  ;;  %s417_s10 = sshll.u32 (!%p166_p9), %s190_s9, 4  ;;  %s878_s10 = int_to_ptr.vmem [resolvable:$true] %s417_s10 }
  0x14   : > { %v224_v32 = vld [vmem:[%s921_s3 + $0xd8] sm:$0xff] (!%p166_p9)  ;;  %v553_v33 = vpack.c.bf16 (!%p166_p9), %v206_v30, %v205_v29  ;;  %v207_v35 = vld [vmem:[%s921_s3 + $0x50] sm:$0xff] (!%p166_p9)  ;;  %v225_v37 = vld [vmem:[%s921_s3 + $0xe0] sm:$0xff] (!%p166_p9)  ;;  %v397_v5 = vsub.s32 (!%p166_p9), %v394_v3, %v396_v4  ;;  %s616_s20 = scalar_lea.vmem (!%p166_p9), %s878_s10, 128 }
  0x15   : > { %s192_s28 = scalar_select %p191_p10, %s731_s19, 1  ;;  %542 = vmatpush3.bf16.msra.mxu0 %v541_v13  ;;  %v555_v34 = vpack.c.bf16 %v224_v32, %v223_v31  ;;  %v208_v36 = vld [vmem:[%s921_s3 + $0x58] sm:$0xff]  ;;  %v226_v38 = vld [vmem:[%s921_s3 + $0xe8] sm:$0xff]  ;;  %v209_v41 = vld [vmem:[%s921_s3 + $0x60] sm:$0xff] }
  0x16   : > { %544 = vmatprep.subr.bf16.mxu0 %v543_v14  ;;  %v557_v39 = vpack.c.bf16 %v208_v36, %v207_v35  ;;  %v559_v40 = vpack.c.bf16 %v226_v38, %v225_v37  ;;  %v210_v42 = vld [vmem:[%s921_s3 + $0x68] sm:$0xff]  ;;  %v227_v43 = vld [vmem:[%s921_s3 + $0xf0] sm:$0xff]  ;;  %v228_v44 = vld [vmem:[%s921_s3 + $0xf8] sm:$0xff]  ;;  %p617_p11 = scmp.ne.s32.totalorder %s878_s10, %s616_s20 }
  0x17   : > { %s491_s5 = sshll.u32 %s192_s28, 3  ;;  %v561_v45 = vpack.c.bf16 %v210_v42, %v209_v41  ;;  %v563_v46 = vpack.c.bf16 %v228_v44, %v227_v43  ;;  %v211_v47 = vld [vmem:[%s921_s3 + $0x70] sm:$0xff]  ;;  %v212_v48 = vld [vmem:[%s921_s3 + $0x78] sm:$0xff]  ;;  %v302_v54 = vld [vmem:[%s919_s1] sm:$0xf] }
  0x18   : > { %s195_s22 = scalar_lea.vmem %s918_s0, %s491_s5  ;;  %v565_v49 = vpack.c.bf16 %v212_v48, %v211_v47  ;;  %v303_v56 = vld [vmem:[%s920_s2] sm:$0xf]  ;;  %s492_s5 = sshll.u32 %s731_s19, 7 }
  0x19   : > { %v817_v25 = vld [vmem:[%s195_s22] sm:$0xff]  ;;  %546 = vmatpush3.bf16.msra.mxu0 %v545_v19  ;;  %s876_s13 = scalar_lea.hbm %s922_s4, %s492_s5  ;;  %p618_p12 = pnand %p617_p11, %p748_p5 }
  0x1a   : > { %v230_v26 = vcombine.high %v817_v25, %v817_v25  ;;  %548 = vmatprep.subr.bf16.mxu0 %v547_v20  ;;  %s684_s19 = smov [#allocation2]  }
  0x1b   : > { %p619_p13 = pneg %p618_p12  ;;  %s620_s22 = sshll.u32 %s684_s19, 4  ;;  %s621_s22 = int_to_ptr.vmem [resolvable:$false] %s620_s22 }
  0x1c   : > { %296 = vmatprep.mubr.f32.mxu0 %v230_v26  ;;  %s622_s23 = scalar_lea.vmem %s621_s22, 256  ;;  %p623_p0 = scmp.lt.s32.totalorder %s878_s10, %s621_s22 }
  0x1d   : > { %550 = vmatpush3.bf16.msra.mxu0 %v549_v27  ;;  %p624_p1 = scmp.lt.s32.totalorder %s622_s23, %s616_s20 }
  0x1e   : > { %552 = vmatprep.subr.bf16.mxu0 %v551_v28 }
  0x1f   : > { %p625_p2 = por %p624_p1, %p623_p0 }
  0x21   : > { %554 = vmatpush3.bf16.msra.mxu0 %v553_v33  ;;  %p626_p3 = pnand %p625_p2, %p619_p13 }
  0x22   : > { %556 = vmatprep.subr.bf16.mxu0 %v555_v34 }
  0x25   : > { %558 = vmatpush3.bf16.msra.mxu0 %v557_v39 }
  0x26   : > { %560 = vmatprep.subr.bf16.mxu0 %v559_v40 }
  0x29   : > { %562 = vmatpush3.bf16.msra.mxu0 %v561_v45 }
  0x2a   : > { %564 = vmatprep.subr.bf16.mxu0 %v563_v46 }
  0x2d   : > { %566 = vmatpush3.bf16.msra.mxu0 %v565_v49 }
  0x30   : > { %297 = vmatmul.mubr.f32.vlgmr.msra.gmra.mrb[0].mxu0 %v817_v25 }
 0x103   : > { %v525_v51 = vpop.f32.mrb[0].mxu0 }
 0x104   : > { %v526_v52 = vpop.f32.mrb[1].mxu0 }
 0x105   : > { %v527_v53 = vadd.f32 %v526_v52, %v525_v51 }
 0x107   : > { %531 = vmatpush3.msk.msra.mxu1 %vm308_vm1, %v527_v53 }
 0x108   : > { %533 = vmatmul.mubr.msk.f32.vlgmr.msra.gmra.mrb[0].mxu1 %vm304_vm2, %v302_v54 }
 0x1db   : > { %v378_v57 = vpop.f32.mrb[0].mxu1 }
 0x1dc   : > { %v379_v58 = vadd.f32 %v378_v57, %v303_v56  ;;  %v534_v59 = vpop.f32.mrb[1].mxu1 }
 0x1de   : > { %v485_v60 = vmul.f32 -1.442695, %v379_v58 }
 0x1e0   : > { %612 = vpow2.f32 %v485_v60 }
 0x1ea   : > { %v613_v61 = vpop.eup %612 }
 0x1eb   : > { %v385_v62 = vadd.f32 1.0, %v613_v61 }
 0x1ed   : > { %614 = vrcp.f32 %v385_v62 }
 0x1f7   : > { %v615_v63 = vpop.eup %614 }
 0x1f8   : > { %390 = vperm.xlu0 %610, %v615_v63  }
 0x277   : > { %v391_v6 = vpop.permute.xlu0 %390 }
 0x278   : > { %v398_v7 = vrot.slane %v391_v6, %v397_v5 }
 0x27a   : > { %v400_v8 = vmul.f32 %v398_v7, %v817_v25 }
 0x27c   : > { %401 = vst [vmem:[%s190_s9] sm:$0xff] %v400_v8 }
 0x27d   : > { %629 = shalt.err (!%p626_p3)
}
 0x27e   : > { %s630_s27 = scalar_lea.hbm %s876_s13, 128  ;;  %s634_s30 = scalar_lea.hbm %s922_s4, 256 }
 0x27f   : > { %p631_p4 = scmp.ne.s32.totalorder %s876_s13, %s630_s27  ;;  %p635_p9 = scmp.lt.u32.totalorder %s876_s13, %s922_s4 }
 0x280   : > { %p636_p10 = scmp.lt.u32.totalorder %s634_s30, %s630_s27  ;;  %p638_p12 = scmp.lt.u32.totalorder %s630_s27, %s876_s13 }
 0x281   : > { %p632_p7 = pnand %p631_p4, %p748_p5 }
 0x282   : > { %p637_p11 = por %p636_p10, %p635_p9 }
 0x283   : > { %p633_p8 = pneg %p632_p7 }
 0x284   : > { %p639_p13 = por %p638_p12, %p637_p11 }
 0x286   : > { %p640_p0 = pnand %p639_p13, %p633_p8 }
 0x288   : > { %643 = shalt.err (!%p640_p0)
}
 0x289   : > { %567 = dma.vmem_to_hbm [thread:$0]  (%p748_p5), %s878_s10, 128, %s876_s13, %s403_s14  }
 0x28a PF: > { %p573_p1 = scmp.ge.s32.totalorder %s678_s18, 2  ;;  %s429_s8 = sand.u32 1, %s666_s15  }
 0x28b   : > { %s430_s5 = scalar_lea.sflag [#allocation3], %s429_s8 }
 0x28c   : > { %p570_p2 = pnand %p573_p1, %p752_p6 }
 0x28e   : > { %661 = dma.done.wait (!%p570_p2), %s430_s5, 128  }
 0x28f   : > { %663 = vsyncadd (!%p570_p2), %s430_s5, 4294967168  ;;  %p14_p3 = scmp.ge.s32.totalorder %s735_s21, 4   ;;  %s925_s15 = smov %s670_s16 }
 0x290   : > { %s926_s16 = smov %s674_s17  ;;  %s927_s17 = smov %s746_s24 }
 0x291   : > { %s928_s18 = smov %s735_s21  ;;  %16 = sbr.rel (!%p14_p3) target bundleno = 3 (0x3), region = 71 }
 0x298   :  { %435 = vsyncpa [#allocation3], 1 }
 0x299   :  { %437 = vsyncpa [#allocation3 + $0x1], 1 }

</bundles_post_ra>
